<compile_context>
chip_gen: v6e
topology: v6e:2x2x1
jax: 0.10.0
libtpu: 0.0.40
codegen_flags: <defaults>
</compile_context>

<pallas_src>
import math
import functools

import numpy as np
import jax
import jax.numpy as jnp
from jax.experimental import pallas as pl
from jax.experimental.pallas import tpu as pltpu


def _round_up(x, m):
    return (x + m - 1) // m * m


def _priorbox_kernel(centers_ref, col_ref, out_ref, *, clip):
    """prior[k, cell] = sel_x[k]*cx_n[cell] + sel_y[k]*cy_n[cell] + half_inv[k].

    centers_ref : (2, HWp) f32 -- row 0 = (w+0.5)*step_x / img_w, row 1 = (h+0.5)*step_y / img_h
                   (lane axis = cell index h*W + w, zero-padded to a multiple of 128)
    col_ref     : (K, 8)  f32 -- col 0 = sel_x, col 1 = sel_y, col 2 = half_inv (rest pad)
    out_ref     : (K, HWp) f32 -- prior[p*4+c, h*W+w]
    """
    cx = centers_ref[0:1, :]          # (1, HWp)
    cy = centers_ref[1:2, :]          # (1, HWp)
    col = col_ref[...]                # (K, 8)
    sel_x = col[:, 0:1]               # (K, 1)
    sel_y = col[:, 1:2]               # (K, 1)
    half_inv = col[:, 2:3]            # (K, 1)

    prior = sel_x * cx + sel_y * cy + half_inv   # (K, HWp), pure VPU broadcasts
    if clip:
        prior = jnp.clip(prior, 0.0, 1.0)
    out_ref[...] = prior


@functools.partial(jax.jit, static_argnames=("H", "W", "P", "clip"))
def _build_priors(centers, col_tbl, *, H, W, P, clip):
    """Single fused executable: pallas_call -> strip lane padding -> (H, W, P, 4)."""
    K = P * 4
    HWp = centers.shape[1]
    HW = H * W

    kernel = functools.partial(_priorbox_kernel, clip=clip)
    flat = pl.pallas_call(
        kernel,
        out_shape=jax.ShapeDtypeStruct((K, HWp), jnp.float32),
        in_specs=[
            pl.BlockSpec(memory_space=pltpu.MemorySpace.VMEM),  # centers (2, HWp)
            pl.BlockSpec(memory_space=pltpu.MemorySpace.VMEM),  # column table (K, 8)
        ],
        out_specs=pl.BlockSpec(memory_space=pltpu.MemorySpace.VMEM),
    )(centers, col_tbl)

    flat = flat[:, :HW]                                   # drop lane padding
    return jnp.transpose(flat.reshape(P, 4, H, W), (2, 3, 0, 1))


class PriorBoxLayer:
    """JAX/Pallas port of the PyTorch PriorBoxLayer (forward semantics only)."""

    def __init__(self, min_size, max_size, aspect_ratios, clip, round_up_bbox=False):
        self.min_size = min_size
        self.max_size = max_size
        self.aspect_ratios = aspect_ratios
        self.clip = clip
        self.round_up_bbox = round_up_bbox  # TODO(synk): unused in the reference forward
        self.num_priors = len(aspect_ratios) + 1
        if max_size is not None:
            self.num_priors += 1
        self.priors = None
        self._cache_key = None  # (img_h, img_w, H, W)

    def _box_dims(self):
        box_width = [float(self.min_size)]
        box_height = [float(self.min_size)]
        if self.max_size is not None:
            s = math.sqrt(self.min_size * self.max_size)
            box_width.append(s)
            box_height.append(s)
        for r in self.aspect_ratios:
            box_width.append(self.min_size * math.sqrt(r))
            box_height.append(self.min_size / math.sqrt(r))
        return box_width, box_height

    def __call__(self, img, feature):
        img_height = img.shape[2]
        img_width = img.shape[3]
        layer_height = feature.shape[2]
        layer_width = feature.shape[3]
        step_x = 1.0 * img_width / layer_width
        step_y = 1.0 * img_height / layer_height

        key = (img_height, img_width, layer_height, layer_width)
        if self.priors is None or self._cache_key != key:
            P = self.num_priors
            K = P * 4
            H, W = layer_height, layer_width
            HW = H * W
            HWp = _round_up(HW, 128)          # lane-dense, unmasked stores

            # ---- host-side (numpy) parameter tables: zero XLA dispatches ----
            # normalized per-cell centers, cell index = h*W + w (lane axis)
            w_idx = np.arange(W, dtype=np.float32)
            h_idx = np.arange(H, dtype=np.float32)
            cx_n = np.tile((w_idx + 0.5) * np.float32(step_x), H) / np.float32(img_width)
            cy_n = np.repeat((h_idx + 0.5) * np.float32(step_y), W) / np.float32(img_height)
            centers = np.zeros((2, HWp), dtype=np.float32)
            centers[0, :HW] = cx_n
            centers[1, :HW] = cy_n

            # per-column (prior*4 + coord) table: sel_x, sel_y, half_inv
            box_w, box_h = self._box_dims()
            add_mask = [-1.0, -1.0, 1.0, 1.0]
            col_tbl = np.zeros((K, 8), dtype=np.float32)
            for p in range(P):
                for c in range(4):
                    k = p * 4 + c
                    is_x = (c % 2 == 0)
                    dim = box_w[p] if is_x else box_h[p]
                    img_dim = img_width if is_x else img_height
                    col_tbl[k, 0] = 1.0 if is_x else 0.0
                    col_tbl[k, 1] = 0.0 if is_x else 1.0
                    col_tbl[k, 2] = add_mask[c] * dim / 2.0 / img_dim

            self.priors = _build_priors(
                jnp.asarray(centers), jnp.asarray(col_tbl),
                H=H, W=W, P=P, clip=bool(self.clip))
            self._cache_key = key

        return self.priors


def _reference_priors(img, feature, min_size, max_size, aspect_ratios, clip):
    """Pure-JAX reference mirroring the PyTorch code, for verification."""
    img_h, img_w = img.shape[2], img.shape[3]
    H, W = feature.shape[2], feature.shape[3]
    step_x = 1.0 * img_w / W
    step_y = 1.0 * img_h / H
    num_priors = len(aspect_ratios) + 1 + (1 if max_size is not None else 0)

    w = jnp.broadcast_to(jnp.arange(W, dtype=jnp.float32)[None, :], (H, W))
    h = jnp.broadcast_to(jnp.arange(H, dtype=jnp.float32)[:, None], (H, W))
    cx = (w + 0.5) * step_x
    cy = (h + 0.5) * step_y
    center = jnp.stack((cx, cy, cx, cy), axis=2)[:, :, None, :]
    center = jnp.broadcast_to(center, (H, W, num_priors, 4))

    add_mask = jnp.asarray([-1.0, -1.0, 1.0, 1.0], dtype=jnp.float32)

    bw = [float(min_size)]
    bh = [float(min_size)]
    if max_size is not None:
        s = math.sqrt(min_size * max_size)
        bw.append(s)
        bh.append(s)
    for r in aspect_ratios:
        bw.append(min_size * math.sqrt(r))
        bh.append(min_size / math.sqrt(r))
    bw = jnp.asarray(bw, dtype=jnp.float32)
    bh = jnp.asarray(bh, dtype=jnp.float32)
    box_dim = jnp.stack((bw, bh, bw, bh), axis=1)[None, None, :, :]

    img_dim = jnp.asarray([img_w, img_h, img_w, img_h], dtype=jnp.float32)
    priors = (center + add_mask * box_dim / 2.0) / img_dim
    if clip:
        priors = jnp.clip(priors, 0.0, 1.0)
    return priors


if __name__ == "__main__":
    key = jax.random.PRNGKey(0)
    k1, k2, k3, k4 = jax.random.split(key, 4)

    # Case 1: HW = 256 (already lane-aligned). Only shapes feed the computation.
    img = jax.random.normal(k1, (2, 3, 32, 32), dtype=jnp.float32)
    feature = jax.random.normal(k2, (2, 4, 16, 16), dtype=jnp.float32)

    layer = PriorBoxLayer(min_size=30.0, max_size=60.0, aspect_ratios=[2.0, 3.0],
                          clip=True, round_up_bbox=False)
    priors = jax.block_until_ready(layer(img, feature))

    ref = _reference_priors(img, feature, 30.0, 60.0, [2.0, 3.0], True)
    assert priors.shape == (16, 16, 4, 4), priors.shape
    assert jnp.allclose(priors, ref, atol=1e-5, rtol=1e-5), "mismatch vs reference (16x16)"

    # Second call with the same shapes hits the cache and must return identical priors.
    priors2 = jax.block_until_ready(layer(img, feature))
    assert jnp.array_equal(priors, priors2)

    # Case 2: ragged HW = 100 (exercises the lane padding path, HWp = 128).
    img_b = jax.random.normal(k3, (2, 3, 40, 40), dtype=jnp.float32)
    feature_b = jax.random.normal(k4, (2, 4, 10, 10), dtype=jnp.float32)
    layer_b = PriorBoxLayer(min_size=20.0, max_size=None, aspect_ratios=[2.0],
                            clip=False, round_up_bbox=False)
    priors_b = jax.block_until_ready(layer_b(img_b, feature_b))
    ref_b = _reference_priors(img_b, feature_b, 20.0, None, [2.0], False)
    assert priors_b.shape == (10, 10, 2, 4), priors_b.shape
    assert jnp.allclose(priors_b, ref_b, atol=1e-5, rtol=1e-5), "mismatch vs reference (10x10)"

    print("KERNEL_OK")
</pallas_src>

<mosaic_0001>
module attributes {stable_mosaic.version = 11 : i64} {
  func.func @_priorbox_kernel(%arg0: memref<2x256xf32, #tpu.memory_space<vmem>>, %arg1: memref<16x8xf32, #tpu.memory_space<vmem>>, %arg2: memref<16x256xf32, #tpu.memory_space<vmem>>) attributes {dimension_semantics = [], scalar_prefetch = 0 : i64, scratch_operands = 0 : i64, tpu.core_type = #tpu.core_type<tc>} {
    %c0 = arith.constant 0 : index
    %c0_0 = arith.constant 0 : index
    %0 = vector.load %arg0[%c0, %c0_0] : memref<2x256xf32, #tpu.memory_space<vmem>>, vector<1x256xf32>
    %c1 = arith.constant 1 : index
    %c0_1 = arith.constant 0 : index
    %1 = vector.load %arg0[%c1, %c0_1] : memref<2x256xf32, #tpu.memory_space<vmem>>, vector<1x256xf32>
    %c0_2 = arith.constant 0 : index
    %c0_3 = arith.constant 0 : index
    %2 = vector.load %arg1[%c0_2, %c0_3] : memref<16x8xf32, #tpu.memory_space<vmem>>, vector<16x8xf32>
    %3 = vector.extract_strided_slice %2 {offsets = [0, 0], sizes = [16, 1], strides = [1, 1]} : vector<16x8xf32> to vector<16x1xf32>
    %4 = vector.extract_strided_slice %2 {offsets = [0, 1], sizes = [16, 1], strides = [1, 1]} : vector<16x8xf32> to vector<16x1xf32>
    %5 = vector.extract_strided_slice %2 {offsets = [0, 2], sizes = [16, 1], strides = [1, 1]} : vector<16x8xf32> to vector<16x1xf32>
    %6 = vector.broadcast %3 : vector<16x1xf32> to vector<16x256xf32>
    %7 = vector.broadcast %0 : vector<1x256xf32> to vector<16x256xf32>
    %8 = arith.mulf %6, %7 : vector<16x256xf32>
    %9 = vector.broadcast %4 : vector<16x1xf32> to vector<16x256xf32>
    %10 = vector.broadcast %1 : vector<1x256xf32> to vector<16x256xf32>
    %11 = arith.mulf %9, %10 : vector<16x256xf32>
    %12 = arith.addf %8, %11 : vector<16x256xf32>
    %13 = vector.broadcast %5 : vector<16x1xf32> to vector<16x256xf32>
    %14 = arith.addf %12, %13 : vector<16x256xf32>
    %cst = arith.constant 0.000000e+00 : f32
    %cst_4 = arith.constant 1.000000e+00 : f32
    %15 = vector.broadcast %cst : f32 to vector<16x256xf32>
    %16 = arith.maximumf %15, %14 : vector<16x256xf32>
    %17 = vector.broadcast %cst_4 : f32 to vector<16x256xf32>
    %18 = arith.minimumf %17, %16 : vector<16x256xf32>
    %c0_5 = arith.constant 0 : index
    %c0_6 = arith.constant 0 : index
    %19 = vector.load %arg2[%c0_5, %c0_6] : memref<16x256xf32, #tpu.memory_space<vmem>>, vector<16x256xf32>
    tpu.vector_store %arg2[%c0_5, %c0_6], %18 {strides = array<i32>} : memref<16x256xf32, #tpu.memory_space<vmem>>, vector<16x256xf32>,
    return
  }
}

</mosaic_0001>

<bundles_post_ra>
// kernel: _build_priors.1
= control target key start
LH: loop header
LB: loop body
LE: loop exit
PB: predicated region body
PF: predicated region fallthrough
CT: control target
= control target key end

     0   :  { %v104_v0 = vmov 1   ;;  %v105_v1 = vmov 0   ;;  %v106_v4 = vmov 2   ;;  %v27_v5 = vlaneseq  ;;  %s146_s1 = inlined_call_operand.vmem [shape: f32[16,8], index: 1, kind: input, shape index: {}]   ;;  %s147_s0 = inlined_call_operand.vmem [shape: f32[2,256], index: 0, kind: input, shape index: {}]   ;;  %s148_s2 = inlined_call_operand.vmem [shape: f32[16,256], index: 2, kind: output, shape index: {}]  }
   0x1   :  { %101 = vset.pattern.permute.xlu1 %v104_v0  ;;  %100 = vset.pattern.permute.xlu0 %v105_v1  ;;  %v14_v2 = vld [vmem:[%s146_s1] sm:$0xff]  ;;  %v15_v3 = vld [vmem:[%s146_s1 + $0x8] sm:$0xff] }
   0x2   :  { %42 = vperm.xlu1 %101, %v14_v2   ;;  %18 = vperm.xlu0 %100, %v14_v2   ;;  %v28_v6 = vshrl.u32 %v27_v5, 7  ;;  %v96_v9 = vld [vmem:[%s147_s0 + $0x1] ss:$2 sm:$0x3] }
   0x3   :  { %v11_v10 = vld [vmem:[%s147_s0] ss:$2 sm:$0x3] }
   0x4   :  { %v29_v7 = vsub.s32 0, %v28_v6  ;;  %v33_v8 = vsub.s32 1, %v28_v6 }
   0x6   :  { %46 = vperm.xlu1 %101, %v15_v3   ;;  %23 = vperm.xlu0 %100, %v15_v3   ;;  %v53_v12 = vrot.slane %v96_v9, %v29_v7  ;;  %v57_v13 = vrot.slane %v96_v9, %v33_v8  ;;  %v30_v15 = vrot.slane %v11_v10, %v29_v7 }
   0x7   :  { %v34_v16 = vrot.slane %v11_v10, %v33_v8 }
   0xa   :  { %103 = vset.pattern.permute.xlu1 %v106_v4  ;;  %102 = vset.pattern.permute.xlu0 %v106_v4 }
   0xb   :  { %73 = vperm.xlu1 %103, %v15_v3   ;;  %69 = vperm.xlu0 %102, %v14_v2  }
  0x7d   :  { %v43_v11 = vpop.permute.xlu1 %42  ;;  %v19_v14 = vpop.permute.xlu0 %18 }
  0x7e   :  { %v60_v17 = vmul.f32 %v53_v12, %v43_v11  ;;  %v61_v18 = vmul.f32 %v57_v13, %v43_v11  ;;  %v37_v19 = vmul.f32 %v30_v15, %v19_v14  ;;  %v38_v20 = vmul.f32 %v34_v16, %v19_v14 }
  0x80   :  { %v64_v29 = vadd.f32 %v60_v17, %v37_v19  ;;  %v65_v30 = vadd.f32 %v61_v18, %v38_v20 }
  0x81   :  { %v47_v21 = vpop.permute.xlu1 %46  ;;  %v24_v22 = vpop.permute.xlu0 %23 }
  0x82   :  { %v62_v23 = vmul.f32 %v53_v12, %v47_v21  ;;  %v63_v24 = vmul.f32 %v57_v13, %v47_v21  ;;  %v39_v25 = vmul.f32 %v30_v15, %v24_v22  ;;  %v40_v26 = vmul.f32 %v34_v16, %v24_v22 }
  0x84   :  { %v66_v27 = vadd.f32 %v62_v23, %v39_v25  ;;  %v67_v28 = vadd.f32 %v63_v24, %v40_v26 }
  0x86   :  { %v74_v31 = vpop.permute.xlu1 %73  ;;  %v70_v32 = vpop.permute.xlu0 %69 }
  0x87   :  { %v78_v33 = vadd.f32 %v74_v31, %v66_v27  ;;  %v79_v34 = vadd.f32 %v74_v31, %v67_v28  ;;  %v76_v35 = vadd.f32 %v70_v32, %v64_v29  ;;  %v77_v36 = vadd.f32 %v70_v32, %v65_v30 }
  0x89   :  { %v82_v37 = vmax.f32 %v78_v33, 0.0  ;;  %v83_v38 = vmax.f32 %v79_v34, 0.0  ;;  %v80_v39 = vmax.f32 %v76_v35, 0.0  ;;  %v81_v40 = vmax.f32 %v77_v36, 0.0 }
  0x8b   :  { %v86_v41 = vmin.f32 %v82_v37, 1.0  ;;  %v87_v42 = vmin.f32 %v83_v38, 1.0  ;;  %v84_v43 = vmin.f32 %v80_v39, 1.0  ;;  %v85_v44 = vmin.f32 %v81_v40, 1.0 }
  0x8d   :  { %90 = vst [vmem:[%s148_s2 + $0x10] sm:$0xff] %v86_v41  ;;  %91 = vst [vmem:[%s148_s2 + $0x18] sm:$0xff] %v87_v42 }
  0x8e   :  { %88 = vst [vmem:[%s148_s2] sm:$0xff] %v84_v43  ;;  %89 = vst [vmem:[%s148_s2 + $0x8] sm:$0xff] %v85_v44 }

</bundles_post_ra>
